<compile_context>
chip_gen: v6e
topology: v6e:2x2x1
jax: 0.10.0
libtpu: 0.0.40
codegen_flags: <defaults>
</compile_context>

<pallas_src>
import functools

import jax
import jax.numpy as jnp
from jax.experimental import pallas as pl
from jax.experimental.pallas import tpu as pltpu


def _gather_tile_kernel(b_tile, idx_ref, emb_hbm_ref, out_ref, row_buf, sems):
    """Gather `b_tile` table rows into one output tile.

    idx_ref:     (B_padded,) int32 scalar-prefetch ref (SMEM).
    emb_hbm_ref: (V, D) embedding table left in HBM (memory_space=pl.ANY).
    out_ref:     (b_tile, D) VMEM output tile.
    row_buf:     (b_tile, D) VMEM scratch the row DMAs land in.
    sems:        (b_tile,) DMA semaphores.
    """
    base = pl.program_id(0) * b_tile

    # Issue all row DMAs first so their HBM latencies overlap ...
    for r in range(b_tile):
        row = idx_ref[base + r]
        pltpu.make_async_copy(
            emb_hbm_ref.at[row], row_buf.at[r], sems.at[r]
        ).start()

    # ... then drain them (descriptor is reconstructed; only shape/sem matter).
    for r in range(b_tile):
        pltpu.make_async_copy(
            emb_hbm_ref.at[0], row_buf.at[r], sems.at[r]
        ).wait()

    out_ref[...] = row_buf[...]


def category_encoder(category, emb_table, *, b_tile=8):
    """Embedding lookup: (B,) int32 indices -> (B, D) rows of emb_table.

    Equivalent to torch.nn.Embedding(num_categories, D, padding_idx=0)(category)
    given a table whose row 0 is zero.
    For large batches, raise b_tile (e.g. 32/128) to amortize per-grid-step
    overhead and issue more concurrent row DMAs.
    """
    B = category.shape[0]
    V, D = emb_table.shape

    idx = category.astype(jnp.int32)
    # Pad the batch to a multiple of the tile; index 0 is the (zero) padding row.
    b_pad = pl.cdiv(B, b_tile) * b_tile
    if b_pad != B:
        idx = jnp.concatenate([idx, jnp.zeros((b_pad - B,), jnp.int32)])

    grid_spec = pltpu.PrefetchScalarGridSpec(
        num_scalar_prefetch=1,
        grid=(b_pad // b_tile,),
        in_specs=[
            pl.BlockSpec(memory_space=pl.ANY),  # table stays in HBM, rows DMA'd on demand
        ],
        out_specs=pl.BlockSpec((b_tile, D), lambda i, ids: (i, 0)),
        scratch_shapes=[
            pltpu.VMEM((b_tile, D), emb_table.dtype),
            pltpu.SemaphoreType.DMA((b_tile,)),
        ],
    )

    out = pl.pallas_call(
        functools.partial(_gather_tile_kernel, b_tile),
        out_shape=jax.ShapeDtypeStruct((b_pad, D), emb_table.dtype),
        grid_spec=grid_spec,
        compiler_params=pltpu.CompilerParams(
            dimension_semantics=("parallel",),
        ),
    )(idx, emb_table)

    return out[:B] if b_pad != B else out


if __name__ == "__main__":
    num_categories = 16
    category_embedding_dim = 128
    batch = 8

    key = jax.random.PRNGKey(0)
    k_emb, k_idx = jax.random.split(key)

    # Deterministic parameter init (nn.Embedding: N(0,1); padding_idx=0 row is zero).
    emb_table = jax.random.normal(
        k_emb, (num_categories, category_embedding_dim), dtype=jnp.float32
    )
    emb_table = emb_table.at[0].set(0.0)

    # Example category ids, including the padding index 0.
    category = jax.random.randint(k_idx, (batch,), 0, num_categories, dtype=jnp.int32)

    out = jax.block_until_ready(category_encoder(category, emb_table))

    # Reference check against plain JAX gather.
    ref = jnp.take(emb_table, category, axis=0)
    assert out.shape == (batch, category_embedding_dim)
    assert jnp.allclose(out, ref, atol=1e-6), "mismatch vs reference embedding lookup"

    print("KERNEL_OK")
</pallas_src>

<mosaic_0001>
module attributes {stable_mosaic.version = 11 : i64} {
  func.func @_gather_tile_kernel(%arg0: i32, %arg1: memref<8xi32, #tpu.memory_space<smem>>, %arg2: memref<16x128xf32, #tpu.memory_space<any>>, %arg3: memref<8x128xf32, #tpu.memory_space<vmem>>, %arg4: memref<8x128xf32, #tpu.memory_space<vmem>>, %arg5: memref<8x!tpu.dma_semaphore, #tpu.memory_space<semaphore_mem>>) attributes {dimension_semantics = [#tpu.dimension_semantics<parallel>], iteration_bounds = array<i64: 1>, scalar_prefetch = 1 : i64, scratch_operands = 2 : i64, tpu.core_type = #tpu.core_type<tc>, window_params = [{}, {transform_indices = @transform_1, window_bounds = array<i64: 8, 128>}]} {
    %c8_i32 = arith.constant 8 : i32
    %0 = arith.muli %arg0, %c8_i32 : i32
    %c0_i32 = arith.constant 0 : i32
    %1 = arith.addi %0, %c0_i32 : i32
    %2 = arith.index_cast %1 : i32 to index
    %3 = memref.load %arg1[%2] : memref<8xi32, #tpu.memory_space<smem>>
    %c0_i32_0 = arith.constant 0 : i32
    %c0_i32_1 = arith.constant 0 : i32
    %c0_i32_2 = arith.constant 0 : i32
    %4 = tpu.memref_slice %arg2[%3, %c0_i32_2] : memref<16x128xf32, #tpu.memory_space<any>> -> memref<1x128xf32, #tpu.memory_space<any>>
    %5 = tpu.memref_squeeze %4 : memref<1x128xf32, #tpu.memory_space<any>> -> memref<128xf32, #tpu.memory_space<any>>
    %c0_i32_3 = arith.constant 0 : i32
    %6 = tpu.memref_slice %arg4[%c0_i32_0, %c0_i32_3] : memref<8x128xf32, #tpu.memory_space<vmem>> -> memref<1x128xf32, #tpu.memory_space<vmem>>
    %7 = tpu.memref_squeeze %6 : memref<1x128xf32, #tpu.memory_space<vmem>> -> memref<128xf32, #tpu.memory_space<vmem>>
    %8 = tpu.memref_slice %arg5[%c0_i32_1] : memref<8x!tpu.dma_semaphore, #tpu.memory_space<semaphore_mem>> -> memref<1x!tpu.dma_semaphore, #tpu.memory_space<semaphore_mem>>
    %9 = tpu.memref_squeeze %8 : memref<1x!tpu.dma_semaphore, #tpu.memory_space<semaphore_mem>> -> memref<!tpu.dma_semaphore, #tpu.memory_space<semaphore_mem>>
    tpu.enqueue_dma source(%5 : memref<128xf32, #tpu.memory_space<any>>) target(%7 : memref<128xf32, #tpu.memory_space<vmem>>) target_semaphore(%9 : memref<!tpu.dma_semaphore, #tpu.memory_space<semaphore_mem>>)
    %c1_i32 = arith.constant 1 : i32
    %10 = arith.addi %0, %c1_i32 : i32
    %11 = arith.index_cast %10 : i32 to index
    %12 = memref.load %arg1[%11] : memref<8xi32, #tpu.memory_space<smem>>
    %c1_i32_4 = arith.constant 1 : i32
    %c1_i32_5 = arith.constant 1 : i32
    %c0_i32_6 = arith.constant 0 : i32
    %13 = tpu.memref_slice %arg2[%12, %c0_i32_6] : memref<16x128xf32, #tpu.memory_space<any>> -> memref<1x128xf32, #tpu.memory_space<any>>
    %14 = tpu.memref_squeeze %13 : memref<1x128xf32, #tpu.memory_space<any>> -> memref<128xf32, #tpu.memory_space<any>>
    %c0_i32_7 = arith.constant 0 : i32
    %15 = tpu.memref_slice %arg4[%c1_i32_4, %c0_i32_7] : memref<8x128xf32, #tpu.memory_space<vmem>> -> memref<1x128xf32, #tpu.memory_space<vmem>>
    %16 = tpu.memref_squeeze %15 : memref<1x128xf32, #tpu.memory_space<vmem>> -> memref<128xf32, #tpu.memory_space<vmem>>
    %17 = tpu.memref_slice %arg5[%c1_i32_5] : memref<8x!tpu.dma_semaphore, #tpu.memory_space<semaphore_mem>> -> memref<1x!tpu.dma_semaphore, #tpu.memory_space<semaphore_mem>>
    %18 = tpu.memref_squeeze %17 : memref<1x!tpu.dma_semaphore, #tpu.memory_space<semaphore_mem>> -> memref<!tpu.dma_semaphore, #tpu.memory_space<semaphore_mem>>
    tpu.enqueue_dma source(%14 : memref<128xf32, #tpu.memory_space<any>>) target(%16 : memref<128xf32, #tpu.memory_space<vmem>>) target_semaphore(%18 : memref<!tpu.dma_semaphore, #tpu.memory_space<semaphore_mem>>)
    %c2_i32 = arith.constant 2 : i32
    %19 = arith.addi %0, %c2_i32 : i32
    %20 = arith.index_cast %19 : i32 to index
    %21 = memref.load %arg1[%20] : memref<8xi32, #tpu.memory_space<smem>>
    %c2_i32_8 = arith.constant 2 : i32
    %c2_i32_9 = arith.constant 2 : i32
    %c0_i32_10 = arith.constant 0 : i32
    %22 = tpu.memref_slice %arg2[%21, %c0_i32_10] : memref<16x128xf32, #tpu.memory_space<any>> -> memref<1x128xf32, #tpu.memory_space<any>>
    %23 = tpu.memref_squeeze %22 : memref<1x128xf32, #tpu.memory_space<any>> -> memref<128xf32, #tpu.memory_space<any>>
    %c0_i32_11 = arith.constant 0 : i32
    %24 = tpu.memref_slice %arg4[%c2_i32_8, %c0_i32_11] : memref<8x128xf32, #tpu.memory_space<vmem>> -> memref<1x128xf32, #tpu.memory_space<vmem>>
    %25 = tpu.memref_squeeze %24 : memref<1x128xf32, #tpu.memory_space<vmem>> -> memref<128xf32, #tpu.memory_space<vmem>>
    %26 = tpu.memref_slice %arg5[%c2_i32_9] : memref<8x!tpu.dma_semaphore, #tpu.memory_space<semaphore_mem>> -> memref<1x!tpu.dma_semaphore, #tpu.memory_space<semaphore_mem>>
    %27 = tpu.memref_squeeze %26 : memref<1x!tpu.dma_semaphore, #tpu.memory_space<semaphore_mem>> -> memref<!tpu.dma_semaphore, #tpu.memory_space<semaphore_mem>>
    tpu.enqueue_dma source(%23 : memref<128xf32, #tpu.memory_space<any>>) target(%25 : memref<128xf32, #tpu.memory_space<vmem>>) target_semaphore(%27 : memref<!tpu.dma_semaphore, #tpu.memory_space<semaphore_mem>>)
    %c3_i32 = arith.constant 3 : i32
    %28 = arith.addi %0, %c3_i32 : i32
    %29 = arith.index_cast %28 : i32 to index
    %30 = memref.load %arg1[%29] : memref<8xi32, #tpu.memory_space<smem>>
    %c3_i32_12 = arith.constant 3 : i32
    %c3_i32_13 = arith.constant 3 : i32
    %c0_i32_14 = arith.constant 0 : i32
    %31 = tpu.memref_slice %arg2[%30, %c0_i32_14] : memref<16x128xf32, #tpu.memory_space<any>> -> memref<1x128xf32, #tpu.memory_space<any>>
    %32 = tpu.memref_squeeze %31 : memref<1x128xf32, #tpu.memory_space<any>> -> memref<128xf32, #tpu.memory_space<any>>
    %c0_i32_15 = arith.constant 0 : i32
    %33 = tpu.memref_slice %arg4[%c3_i32_12, %c0_i32_15] : memref<8x128xf32, #tpu.memory_space<vmem>> -> memref<1x128xf32, #tpu.memory_space<vmem>>
    %34 = tpu.memref_squeeze %33 : memref<1x128xf32, #tpu.memory_space<vmem>> -> memref<128xf32, #tpu.memory_space<vmem>>
    %35 = tpu.memref_slice %arg5[%c3_i32_13] : memref<8x!tpu.dma_semaphore, #tpu.memory_space<semaphore_mem>> -> memref<1x!tpu.dma_semaphore, #tpu.memory_space<semaphore_mem>>
    %36 = tpu.memref_squeeze %35 : memref<1x!tpu.dma_semaphore, #tpu.memory_space<semaphore_mem>> -> memref<!tpu.dma_semaphore, #tpu.memory_space<semaphore_mem>>
    tpu.enqueue_dma source(%32 : memref<128xf32, #tpu.memory_space<any>>) target(%34 : memref<128xf32, #tpu.memory_space<vmem>>) target_semaphore(%36 : memref<!tpu.dma_semaphore, #tpu.memory_space<semaphore_mem>>)
    %c4_i32 = arith.constant 4 : i32
    %37 = arith.addi %0, %c4_i32 : i32
    %38 = arith.index_cast %37 : i32 to index
    %39 = memref.load %arg1[%38] : memref<8xi32, #tpu.memory_space<smem>>
    %c4_i32_16 = arith.constant 4 : i32
    %c4_i32_17 = arith.constant 4 : i32
    %c0_i32_18 = arith.constant 0 : i32
    %40 = tpu.memref_slice %arg2[%39, %c0_i32_18] : memref<16x128xf32, #tpu.memory_space<any>> -> memref<1x128xf32, #tpu.memory_space<any>>
    %41 = tpu.memref_squeeze %40 : memref<1x128xf32, #tpu.memory_space<any>> -> memref<128xf32, #tpu.memory_space<any>>
    %c0_i32_19 = arith.constant 0 : i32
    %42 = tpu.memref_slice %arg4[%c4_i32_16, %c0_i32_19] : memref<8x128xf32, #tpu.memory_space<vmem>> -> memref<1x128xf32, #tpu.memory_space<vmem>>
    %43 = tpu.memref_squeeze %42 : memref<1x128xf32, #tpu.memory_space<vmem>> -> memref<128xf32, #tpu.memory_space<vmem>>
    %44 = tpu.memref_slice %arg5[%c4_i32_17] : memref<8x!tpu.dma_semaphore, #tpu.memory_space<semaphore_mem>> -> memref<1x!tpu.dma_semaphore, #tpu.memory_space<semaphore_mem>>
    %45 = tpu.memref_squeeze %44 : memref<1x!tpu.dma_semaphore, #tpu.memory_space<semaphore_mem>> -> memref<!tpu.dma_semaphore, #tpu.memory_space<semaphore_mem>>
    tpu.enqueue_dma source(%41 : memref<128xf32, #tpu.memory_space<any>>) target(%43 : memref<128xf32, #tpu.memory_space<vmem>>) target_semaphore(%45 : memref<!tpu.dma_semaphore, #tpu.memory_space<semaphore_mem>>)
    %c5_i32 = arith.constant 5 : i32
    %46 = arith.addi %0, %c5_i32 : i32
    %47 = arith.index_cast %46 : i32 to index
    %48 = memref.load %arg1[%47] : memref<8xi32, #tpu.memory_space<smem>>
    %c5_i32_20 = arith.constant 5 : i32
    %c5_i32_21 = arith.constant 5 : i32
    %c0_i32_22 = arith.constant 0 : i32
    %49 = tpu.memref_slice %arg2[%48, %c0_i32_22] : memref<16x128xf32, #tpu.memory_space<any>> -> memref<1x128xf32, #tpu.memory_space<any>>
    %50 = tpu.memref_squeeze %49 : memref<1x128xf32, #tpu.memory_space<any>> -> memref<128xf32, #tpu.memory_space<any>>
    %c0_i32_23 = arith.constant 0 : i32
    %51 = tpu.memref_slice %arg4[%c5_i32_20, %c0_i32_23] : memref<8x128xf32, #tpu.memory_space<vmem>> -> memref<1x128xf32, #tpu.memory_space<vmem>>
    %52 = tpu.memref_squeeze %51 : memref<1x128xf32, #tpu.memory_space<vmem>> -> memref<128xf32, #tpu.memory_space<vmem>>
    %53 = tpu.memref_slice %arg5[%c5_i32_21] : memref<8x!tpu.dma_semaphore, #tpu.memory_space<semaphore_mem>> -> memref<1x!tpu.dma_semaphore, #tpu.memory_space<semaphore_mem>>
    %54 = tpu.memref_squeeze %53 : memref<1x!tpu.dma_semaphore, #tpu.memory_space<semaphore_mem>> -> memref<!tpu.dma_semaphore, #tpu.memory_space<semaphore_mem>>
    tpu.enqueue_dma source(%50 : memref<128xf32, #tpu.memory_space<any>>) target(%52 : memref<128xf32, #tpu.memory_space<vmem>>) target_semaphore(%54 : memref<!tpu.dma_semaphore, #tpu.memory_space<semaphore_mem>>)
    %c6_i32 = arith.constant 6 : i32
    %55 = arith.addi %0, %c6_i32 : i32
    %56 = arith.index_cast %55 : i32 to index
    %57 = memref.load %arg1[%56] : memref<8xi32, #tpu.memory_space<smem>>
    %c6_i32_24 = arith.constant 6 : i32
    %c6_i32_25 = arith.constant 6 : i32
    %c0_i32_26 = arith.constant 0 : i32
    %58 = tpu.memref_slice %arg2[%57, %c0_i32_26] : memref<16x128xf32, #tpu.memory_space<any>> -> memref<1x128xf32, #tpu.memory_space<any>>
    %59 = tpu.memref_squeeze %58 : memref<1x128xf32, #tpu.memory_space<any>> -> memref<128xf32, #tpu.memory_space<any>>
    %c0_i32_27 = arith.constant 0 : i32
    %60 = tpu.memref_slice %arg4[%c6_i32_24, %c0_i32_27] : memref<8x128xf32, #tpu.memory_space<vmem>> -> memref<1x128xf32, #tpu.memory_space<vmem>>
    %61 = tpu.memref_squeeze %60 : memref<1x128xf32, #tpu.memory_space<vmem>> -> memref<128xf32, #tpu.memory_space<vmem>>
    %62 = tpu.memref_slice %arg5[%c6_i32_25] : memref<8x!tpu.dma_semaphore, #tpu.memory_space<semaphore_mem>> -> memref<1x!tpu.dma_semaphore, #tpu.memory_space<semaphore_mem>>
    %63 = tpu.memref_squeeze %62 : memref<1x!tpu.dma_semaphore, #tpu.memory_space<semaphore_mem>> -> memref<!tpu.dma_semaphore, #tpu.memory_space<semaphore_mem>>
    tpu.enqueue_dma source(%59 : memref<128xf32, #tpu.memory_space<any>>) target(%61 : memref<128xf32, #tpu.memory_space<vmem>>) target_semaphore(%63 : memref<!tpu.dma_semaphore, #tpu.memory_space<semaphore_mem>>)
    %c7_i32 = arith.constant 7 : i32
    %64 = arith.addi %0, %c7_i32 : i32
    %65 = arith.index_cast %64 : i32 to index
    %66 = memref.load %arg1[%65] : memref<8xi32, #tpu.memory_space<smem>>
    %c7_i32_28 = arith.constant 7 : i32
    %c7_i32_29 = arith.constant 7 : i32
    %c0_i32_30 = arith.constant 0 : i32
    %67 = tpu.memref_slice %arg2[%66, %c0_i32_30] : memref<16x128xf32, #tpu.memory_space<any>> -> memref<1x128xf32, #tpu.memory_space<any>>
    %68 = tpu.memref_squeeze %67 : memref<1x128xf32, #tpu.memory_space<any>> -> memref<128xf32, #tpu.memory_space<any>>
    %c0_i32_31 = arith.constant 0 : i32
    %69 = tpu.memref_slice %arg4[%c7_i32_28, %c0_i32_31] : memref<8x128xf32, #tpu.memory_space<vmem>> -> memref<1x128xf32, #tpu.memory_space<vmem>>
    %70 = tpu.memref_squeeze %69 : memref<1x128xf32, #tpu.memory_space<vmem>> -> memref<128xf32, #tpu.memory_space<vmem>>
    %71 = tpu.memref_slice %arg5[%c7_i32_29] : memref<8x!tpu.dma_semaphore, #tpu.memory_space<semaphore_mem>> -> memref<1x!tpu.dma_semaphore, #tpu.memory_space<semaphore_mem>>
    %72 = tpu.memref_squeeze %71 : memref<1x!tpu.dma_semaphore, #tpu.memory_space<semaphore_mem>> -> memref<!tpu.dma_semaphore, #tpu.memory_space<semaphore_mem>>
    tpu.enqueue_dma source(%68 : memref<128xf32, #tpu.memory_space<any>>) target(%70 : memref<128xf32, #tpu.memory_space<vmem>>) target_semaphore(%72 : memref<!tpu.dma_semaphore, #tpu.memory_space<semaphore_mem>>)
    %c0_i32_32 = arith.constant 0 : i32
    %c0_i32_33 = arith.constant 0 : i32
    %c0_i32_34 = arith.constant 0 : i32
    %c0_i32_35 = arith.constant 0 : i32
    %73 = tpu.memref_slice %arg2[%c0_i32_32, %c0_i32_35] : memref<16x128xf32, #tpu.memory_space<any>> -> memref<1x128xf32, #tpu.memory_space<any>>
    %74 = tpu.memref_squeeze %73 : memref<1x128xf32, #tpu.memory_space<any>> -> memref<128xf32, #tpu.memory_space<any>>
    %c0_i32_36 = arith.constant 0 : i32
    %75 = tpu.memref_slice %arg4[%c0_i32_33, %c0_i32_36] : memref<8x128xf32, #tpu.memory_space<vmem>> -> memref<1x128xf32, #tpu.memory_space<vmem>>
    %76 = tpu.memref_squeeze %75 : memref<1x128xf32, #tpu.memory_space<vmem>> -> memref<128xf32, #tpu.memory_space<vmem>>
    %77 = tpu.memref_slice %arg5[%c0_i32_34] : memref<8x!tpu.dma_semaphore, #tpu.memory_space<semaphore_mem>> -> memref<1x!tpu.dma_semaphore, #tpu.memory_space<semaphore_mem>>
    %78 = tpu.memref_squeeze %77 : memref<1x!tpu.dma_semaphore, #tpu.memory_space<semaphore_mem>> -> memref<!tpu.dma_semaphore, #tpu.memory_space<semaphore_mem>>
    tpu.wait_dma2 semaphore(%78 : memref<!tpu.dma_semaphore, #tpu.memory_space<semaphore_mem>>) src(%74 : memref<128xf32, #tpu.memory_space<any>>) dst(%76 : memref<128xf32, #tpu.memory_space<vmem>>)
    %c0_i32_37 = arith.constant 0 : i32
    %c1_i32_38 = arith.constant 1 : i32
    %c1_i32_39 = arith.constant 1 : i32
    %c0_i32_40 = arith.constant 0 : i32
    %79 = tpu.memref_slice %arg2[%c0_i32_37, %c0_i32_40] : memref<16x128xf32, #tpu.memory_space<any>> -> memref<1x128xf32, #tpu.memory_space<any>>
    %80 = tpu.memref_squeeze %79 : memref<1x128xf32, #tpu.memory_space<any>> -> memref<128xf32, #tpu.memory_space<any>>
    %c0_i32_41 = arith.constant 0 : i32
    %81 = tpu.memref_slice %arg4[%c1_i32_38, %c0_i32_41] : memref<8x128xf32, #tpu.memory_space<vmem>> -> memref<1x128xf32, #tpu.memory_space<vmem>>
    %82 = tpu.memref_squeeze %81 : memref<1x128xf32, #tpu.memory_space<vmem>> -> memref<128xf32, #tpu.memory_space<vmem>>
    %83 = tpu.memref_slice %arg5[%c1_i32_39] : memref<8x!tpu.dma_semaphore, #tpu.memory_space<semaphore_mem>> -> memref<1x!tpu.dma_semaphore, #tpu.memory_space<semaphore_mem>>
    %84 = tpu.memref_squeeze %83 : memref<1x!tpu.dma_semaphore, #tpu.memory_space<semaphore_mem>> -> memref<!tpu.dma_semaphore, #tpu.memory_space<semaphore_mem>>
    tpu.wait_dma2 semaphore(%84 : memref<!tpu.dma_semaphore, #tpu.memory_space<semaphore_mem>>) src(%80 : memref<128xf32, #tpu.memory_space<any>>) dst(%82 : memref<128xf32, #tpu.memory_space<vmem>>)
    %c0_i32_42 = arith.constant 0 : i32
    %c2_i32_43 = arith.constant 2 : i32
    %c2_i32_44 = arith.constant 2 : i32
    %c0_i32_45 = arith.constant 0 : i32
    %85 = tpu.memref_slice %arg2[%c0_i32_42, %c0_i32_45] : memref<16x128xf32, #tpu.memory_space<any>> -> memref<1x128xf32, #tpu.memory_space<any>>
    %86 = tpu.memref_squeeze %85 : memref<1x128xf32, #tpu.memory_space<any>> -> memref<128xf32, #tpu.memory_space<any>>
    %c0_i32_46 = arith.constant 0 : i32
    %87 = tpu.memref_slice %arg4[%c2_i32_43, %c0_i32_46] : memref<8x128xf32, #tpu.memory_space<vmem>> -> memref<1x128xf32, #tpu.memory_space<vmem>>
    %88 = tpu.memref_squeeze %87 : memref<1x128xf32, #tpu.memory_space<vmem>> -> memref<128xf32, #tpu.memory_space<vmem>>
    %89 = tpu.memref_slice %arg5[%c2_i32_44] : memref<8x!tpu.dma_semaphore, #tpu.memory_space<semaphore_mem>> -> memref<1x!tpu.dma_semaphore, #tpu.memory_space<semaphore_mem>>
    %90 = tpu.memref_squeeze %89 : memref<1x!tpu.dma_semaphore, #tpu.memory_space<semaphore_mem>> -> memref<!tpu.dma_semaphore, #tpu.memory_space<semaphore_mem>>
    tpu.wait_dma2 semaphore(%90 : memref<!tpu.dma_semaphore, #tpu.memory_space<semaphore_mem>>) src(%86 : memref<128xf32, #tpu.memory_space<any>>) dst(%88 : memref<128xf32, #tpu.memory_space<vmem>>)
    %c0_i32_47 = arith.constant 0 : i32
    %c3_i32_48 = arith.constant 3 : i32
    %c3_i32_49 = arith.constant 3 : i32
    %c0_i32_50 = arith.constant 0 : i32
    %91 = tpu.memref_slice %arg2[%c0_i32_47, %c0_i32_50] : memref<16x128xf32, #tpu.memory_space<any>> -> memref<1x128xf32, #tpu.memory_space<any>>
    %92 = tpu.memref_squeeze %91 : memref<1x128xf32, #tpu.memory_space<any>> -> memref<128xf32, #tpu.memory_space<any>>
    %c0_i32_51 = arith.constant 0 : i32
    %93 = tpu.memref_slice %arg4[%c3_i32_48, %c0_i32_51] : memref<8x128xf32, #tpu.memory_space<vmem>> -> memref<1x128xf32, #tpu.memory_space<vmem>>
    %94 = tpu.memref_squeeze %93 : memref<1x128xf32, #tpu.memory_space<vmem>> -> memref<128xf32, #tpu.memory_space<vmem>>
    %95 = tpu.memref_slice %arg5[%c3_i32_49] : memref<8x!tpu.dma_semaphore, #tpu.memory_space<semaphore_mem>> -> memref<1x!tpu.dma_semaphore, #tpu.memory_space<semaphore_mem>>
    %96 = tpu.memref_squeeze %95 : memref<1x!tpu.dma_semaphore, #tpu.memory_space<semaphore_mem>> -> memref<!tpu.dma_semaphore, #tpu.memory_space<semaphore_mem>>
    tpu.wait_dma2 semaphore(%96 : memref<!tpu.dma_semaphore, #tpu.memory_space<semaphore_mem>>) src(%92 : memref<128xf32, #tpu.memory_space<any>>) dst(%94 : memref<128xf32, #tpu.memory_space<vmem>>)
    %c0_i32_52 = arith.constant 0 : i32
    %c4_i32_53 = arith.constant 4 : i32
    %c4_i32_54 = arith.constant 4 : i32
    %c0_i32_55 = arith.constant 0 : i32
    %97 = tpu.memref_slice %arg2[%c0_i32_52, %c0_i32_55] : memref<16x128xf32, #tpu.memory_space<any>> -> memref<1x128xf32, #tpu.memory_space<any>>
    %98 = tpu.memref_squeeze %97 : memref<1x128xf32, #tpu.memory_space<any>> -> memref<128xf32, #tpu.memory_space<any>>
    %c0_i32_56 = arith.constant 0 : i32
    %99 = tpu.memref_slice %arg4[%c4_i32_53, %c0_i32_56] : memref<8x128xf32, #tpu.memory_space<vmem>> -> memref<1x128xf32, #tpu.memory_space<vmem>>
    %100 = tpu.memref_squeeze %99 : memref<1x128xf32, #tpu.memory_space<vmem>> -> memref<128xf32, #tpu.memory_space<vmem>>
    %101 = tpu.memref_slice %arg5[%c4_i32_54] : memref<8x!tpu.dma_semaphore, #tpu.memory_space<semaphore_mem>> -> memref<1x!tpu.dma_semaphore, #tpu.memory_space<semaphore_mem>>
    %102 = tpu.memref_squeeze %101 : memref<1x!tpu.dma_semaphore, #tpu.memory_space<semaphore_mem>> -> memref<!tpu.dma_semaphore, #tpu.memory_space<semaphore_mem>>
    tpu.wait_dma2 semaphore(%102 : memref<!tpu.dma_semaphore, #tpu.memory_space<semaphore_mem>>) src(%98 : memref<128xf32, #tpu.memory_space<any>>) dst(%100 : memref<128xf32, #tpu.memory_space<vmem>>)
    %c0_i32_57 = arith.constant 0 : i32
    %c5_i32_58 = arith.constant 5 : i32
    %c5_i32_59 = arith.constant 5 : i32
    %c0_i32_60 = arith.constant 0 : i32
    %103 = tpu.memref_slice %arg2[%c0_i32_57, %c0_i32_60] : memref<16x128xf32, #tpu.memory_space<any>> -> memref<1x128xf32, #tpu.memory_space<any>>
    %104 = tpu.memref_squeeze %103 : memref<1x128xf32, #tpu.memory_space<any>> -> memref<128xf32, #tpu.memory_space<any>>
    %c0_i32_61 = arith.constant 0 : i32
    %105 = tpu.memref_slice %arg4[%c5_i32_58, %c0_i32_61] : memref<8x128xf32, #tpu.memory_space<vmem>> -> memref<1x128xf32, #tpu.memory_space<vmem>>
    %106 = tpu.memref_squeeze %105 : memref<1x128xf32, #tpu.memory_space<vmem>> -> memref<128xf32, #tpu.memory_space<vmem>>
    %107 = tpu.memref_slice %arg5[%c5_i32_59] : memref<8x!tpu.dma_semaphore, #tpu.memory_space<semaphore_mem>> -> memref<1x!tpu.dma_semaphore, #tpu.memory_space<semaphore_mem>>
    %108 = tpu.memref_squeeze %107 : memref<1x!tpu.dma_semaphore, #tpu.memory_space<semaphore_mem>> -> memref<!tpu.dma_semaphore, #tpu.memory_space<semaphore_mem>>
    tpu.wait_dma2 semaphore(%108 : memref<!tpu.dma_semaphore, #tpu.memory_space<semaphore_mem>>) src(%104 : memref<128xf32, #tpu.memory_space<any>>) dst(%106 : memref<128xf32, #tpu.memory_space<vmem>>)
    %c0_i32_62 = arith.constant 0 : i32
    %c6_i32_63 = arith.constant 6 : i32
    %c6_i32_64 = arith.constant 6 : i32
    %c0_i32_65 = arith.constant 0 : i32
    %109 = tpu.memref_slice %arg2[%c0_i32_62, %c0_i32_65] : memref<16x128xf32, #tpu.memory_space<any>> -> memref<1x128xf32, #tpu.memory_space<any>>
    %110 = tpu.memref_squeeze %109 : memref<1x128xf32, #tpu.memory_space<any>> -> memref<128xf32, #tpu.memory_space<any>>
    %c0_i32_66 = arith.constant 0 : i32
    %111 = tpu.memref_slice %arg4[%c6_i32_63, %c0_i32_66] : memref<8x128xf32, #tpu.memory_space<vmem>> -> memref<1x128xf32, #tpu.memory_space<vmem>>
    %112 = tpu.memref_squeeze %111 : memref<1x128xf32, #tpu.memory_space<vmem>> -> memref<128xf32, #tpu.memory_space<vmem>>
    %113 = tpu.memref_slice %arg5[%c6_i32_64] : memref<8x!tpu.dma_semaphore, #tpu.memory_space<semaphore_mem>> -> memref<1x!tpu.dma_semaphore, #tpu.memory_space<semaphore_mem>>
    %114 = tpu.memref_squeeze %113 : memref<1x!tpu.dma_semaphore, #tpu.memory_space<semaphore_mem>> -> memref<!tpu.dma_semaphore, #tpu.memory_space<semaphore_mem>>
    tpu.wait_dma2 semaphore(%114 : memref<!tpu.dma_semaphore, #tpu.memory_space<semaphore_mem>>) src(%110 : memref<128xf32, #tpu.memory_space<any>>) dst(%112 : memref<128xf32, #tpu.memory_space<vmem>>)
    %c0_i32_67 = arith.constant 0 : i32
    %c7_i32_68 = arith.constant 7 : i32
    %c7_i32_69 = arith.constant 7 : i32
    %c0_i32_70 = arith.constant 0 : i32
    %115 = tpu.memref_slice %arg2[%c0_i32_67, %c0_i32_70] : memref<16x128xf32, #tpu.memory_space<any>> -> memref<1x128xf32, #tpu.memory_space<any>>
    %116 = tpu.memref_squeeze %115 : memref<1x128xf32, #tpu.memory_space<any>> -> memref<128xf32, #tpu.memory_space<any>>
    %c0_i32_71 = arith.constant 0 : i32
    %117 = tpu.memref_slice %arg4[%c7_i32_68, %c0_i32_71] : memref<8x128xf32, #tpu.memory_space<vmem>> -> memref<1x128xf32, #tpu.memory_space<vmem>>
    %118 = tpu.memref_squeeze %117 : memref<1x128xf32, #tpu.memory_space<vmem>> -> memref<128xf32, #tpu.memory_space<vmem>>
    %119 = tpu.memref_slice %arg5[%c7_i32_69] : memref<8x!tpu.dma_semaphore, #tpu.memory_space<semaphore_mem>> -> memref<1x!tpu.dma_semaphore, #tpu.memory_space<semaphore_mem>>
    %120 = tpu.memref_squeeze %119 : memref<1x!tpu.dma_semaphore, #tpu.memory_space<semaphore_mem>> -> memref<!tpu.dma_semaphore, #tpu.memory_space<semaphore_mem>>
    tpu.wait_dma2 semaphore(%120 : memref<!tpu.dma_semaphore, #tpu.memory_space<semaphore_mem>>) src(%116 : memref<128xf32, #tpu.memory_space<any>>) dst(%118 : memref<128xf32, #tpu.memory_space<vmem>>)
    %c0 = arith.constant 0 : index
    %c0_72 = arith.constant 0 : index
    %121 = vector.load %arg4[%c0, %c0_72] : memref<8x128xf32, #tpu.memory_space<vmem>>, vector<8x128xf32>
    %c0_73 = arith.constant 0 : index
    %c0_74 = arith.constant 0 : index
    %122 = vector.load %arg3[%c0_73, %c0_74] : memref<8x128xf32, #tpu.memory_space<vmem>>, vector<8x128xf32>
    tpu.vector_store %arg3[%c0_73, %c0_74], %121 {strides = array<i32>} : memref<8x128xf32, #tpu.memory_space<vmem>>, vector<8x128xf32>,
    return
  }
  func.func @transform_1(%arg0: i32, %arg1: memref<8xi32, #tpu.memory_space<smem>>) -> (i32, i32) {
    %c0_i32 = arith.constant 0 : i32
    %c0_i32_0 = arith.constant 0 : i32
    return %arg0, %c0_i32 : i32, i32
  }
}

</mosaic_0001>

<bundles_post_ra>
// kernel: tpu_custom_call.1
= control target key start
LH: loop header
LB: loop body
LE: loop exit
PB: predicated region body
PF: predicated region fallthrough
CT: control target
= control target key end

     0   :  { %s506_s9 = smov [#allocation5]   ;;  %s659_s0 = inlined_call_operand.hbm [shape: s32[8], index: 0, kind: input, shape index: {}]   ;;  %s660_s1 = inlined_call_operand.hbm [shape: f32[16,128], index: 1, kind: input, shape index: {}]   ;;  %s661_s2 = inlined_call_operand.hbm [shape: f32[8,128], index: 2, kind: output, shape index: {}]  }
   0x1   :  { %8 = dma.hbm_to_smem %s659_s0, 16, %s506_s9, [#allocation4] }
   0x2   :  { %486 = dma.done.wait [#allocation4], 16 }
   0x3   :  { %487 = vsyncadd [#allocation4], 4294967280 }
   0x4   :  { %10 = sfence }
   0x5   :  { %11 = vsyncpa [#allocation7], 0  ;;  %s13_s12 = sld [smem:[#allocation5]]  ;;  %s507_s13 = smov [#allocation2]  }
   0x6   :  { %s23_s14 = sshll.u32 %s507_s13, 4  ;;  %s534_s15 = sld [smem:[#allocation5 + $0x1]]  ;;  %s536_s14 = int_to_ptr.vmem [resolvable:$true] %s23_s14 }
   0x7   :  { %s508_s16 = smov [#allocation2 + $0x1]   ;;  %s538_s18 = sld [smem:[#allocation5 + $0x2]] }
   0x8   :  { %s40_s17 = sshll.u32 %s508_s16, 4  ;;  %s509_s19 = smov [#allocation2 + $0x2]   ;;  %s540_s17 = int_to_ptr.vmem [resolvable:$true] %s40_s17 }
   0x9   :  { %s57_s0 = sshll.u32 %s509_s19, 4  ;;  %s542_s20 = sld [smem:[#allocation5 + $0x3]]  ;;  %s544_s0 = int_to_ptr.vmem [resolvable:$true] %s57_s0 }
   0xa   :  { %s553_s29 = scalar_lea.hbm %s660_s1, 256 }
   0xb   :  { %s249_s21 = sshll.u32 %s13_s12, 4 }
   0xc   :  { %s15_s24 = scalar_lea.hbm %s660_s1, %s249_s21  ;;  %s251_s25 = sshll.u32 %s534_s15, 4 }
   0xd   :  { %s290_s26 = scalar_lea.hbm %s15_s24, 16  ;;  %p293_p1 = scmp.lt.s32.totalorder %s15_s24, %s660_s1 }
   0xe   :  { %p291_p0 = scmp.ne.s32.totalorder %s15_s24, %s290_s26  ;;  %p294_p2 = scmp.lt.s32.totalorder %s553_s29, %s290_s26 }
  0x10   :  { %p295_p3 = por %p294_p2, %p293_p1 }
  0x12   :  { %p296_p4 = pnand %p295_p3, %p291_p0 }
  0x14   :  { %299 = shalt.err (!%p296_p4)  }
  0x15   :  { %s300_s4 = scalar_lea.vmem %s536_s14, 16  ;;  %s562_s5 = scalar_lea.vmem %s536_s14, 128 }
  0x16   :  { %p301_p5 = scmp.ne.s32.totalorder %s536_s14, %s300_s4  ;;  %p305_p6 = scmp.lt.s32.totalorder %s536_s14, %s536_s14 }
  0x17   :  { %p306_p7 = scmp.lt.s32.totalorder %s562_s5, %s300_s4 }
  0x19   :  { %p307_p8 = por %p306_p7, %p305_p6 }
  0x1b   :  { %p308_p9 = pnand %p307_p8, %p301_p5 }
  0x1d   :  { %311 = shalt.err (!%p308_p9)  }
  0x1e   :  { %26 = dma.hbm_to_vmem [thread:$0]  %s15_s24, 16, %s536_s14, [#allocation3] }
  0x1f   :  { %s30_s8 = scalar_lea.hbm %s660_s1, %s251_s25  ;;  %s253_s9 = sshll.u32 %s538_s18, 4 }
  0x20   :  { %s312_s10 = scalar_lea.hbm %s30_s8, 16  ;;  %p315_p11 = scmp.lt.s32.totalorder %s30_s8, %s660_s1 }
  0x21   :  { %p313_p10 = scmp.ne.s32.totalorder %s30_s8, %s312_s10  ;;  %p316_p12 = scmp.lt.s32.totalorder %s553_s29, %s312_s10 }
  0x23   :  { %p317_p13 = por %p316_p12, %p315_p11 }
  0x25   :  { %p318_p0 = pnand %p317_p13, %p313_p10 }
  0x27   :  { %321 = shalt.err (!%p318_p0)  }
  0x28   :  { %s322_s13 = scalar_lea.vmem %s540_s17, 16  ;;  %p327_p2 = scmp.lt.s32.totalorder %s540_s17, %s536_s14 }
  0x29   :  { %p323_p1 = scmp.ne.s32.totalorder %s540_s17, %s322_s13  ;;  %p328_p3 = scmp.lt.s32.totalorder %s562_s5, %s322_s13 }
  0x2b   :  { %p329_p4 = por %p328_p3, %p327_p2 }
  0x2d   :  { %p330_p5 = pnand %p329_p4, %p323_p1 }
  0x2f   :  { %333 = shalt.err (!%p330_p5)  }
  0x30   :  { %43 = dma.hbm_to_vmem [thread:$0]  %s30_s8, 16, %s540_s17, [#allocation3 + $0x1] }
  0x31   :  { %s47_s18 = scalar_lea.hbm %s660_s1, %s253_s9  ;;  %s255_s19 = sshll.u32 %s542_s20, 4 }
  0x32   :  { %s334_s21 = scalar_lea.hbm %s47_s18, 16  ;;  %p337_p7 = scmp.lt.s32.totalorder %s47_s18, %s660_s1 }
  0x33   :  { %p335_p6 = scmp.ne.s32.totalorder %s47_s18, %s334_s21  ;;  %p338_p8 = scmp.lt.s32.totalorder %s553_s29, %s334_s21 }
  0x35   :  { %p339_p9 = por %p338_p8, %p337_p7 }
  0x37   :  { %p340_p10 = pnand %p339_p9, %p335_p6 }
  0x39   :  { %343 = shalt.err (!%p340_p10)  }
  0x3a   :  { %s344_s17 = scalar_lea.vmem %s544_s0, 16  ;;  %p349_p12 = scmp.lt.s32.totalorder %s544_s0, %s536_s14 }
  0x3b   :  { %p345_p11 = scmp.ne.s32.totalorder %s544_s0, %s344_s17  ;;  %p350_p13 = scmp.lt.s32.totalorder %s562_s5, %s344_s17 }
  0x3d   :  { %p351_p0 = por %p350_p13, %p349_p12 }
  0x3f   :  { %p352_p1 = pnand %p351_p0, %p345_p11 }
  0x41   :  { %355 = shalt.err (!%p352_p1)  }
  0x42   :  { %60 = dma.hbm_to_vmem [thread:$0]  %s47_s18, 16, %s544_s0, [#allocation3 + $0x2] }
  0x43   :  { %s64_s25 = scalar_lea.hbm %s660_s1, %s255_s19  ;;  %s510_s26 = smov [#allocation2 + $0x3]  }
  0x44   :  { %s74_s27 = sshll.u32 %s510_s26, 4  ;;  %s256_s28 = sld [smem:[#allocation5 + $0x4]]  ;;  %s75_s27 = int_to_ptr.vmem [resolvable:$true] %s74_s27 }
  0x45   :  { %s356_s30 = scalar_lea.hbm %s64_s25, 16  ;;  %p359_p3 = scmp.lt.s32.totalorder %s64_s25, %s660_s1 }
  0x46   :  { %p357_p2 = scmp.ne.s32.totalorder %s64_s25, %s356_s30  ;;  %p360_p4 = scmp.lt.s32.totalorder %s553_s29, %s356_s30 }
  0x48   :  { %p361_p5 = por %p360_p4, %p359_p3 }
  0x4a   :  { %p362_p6 = pnand %p361_p5, %p357_p2 }
  0x4c   :  { %365 = shalt.err (!%p362_p6)  }
  0x4d   :  { %s366_s6 = scalar_lea.vmem %s75_s27, 16  ;;  %p371_p8 = scmp.lt.s32.totalorder %s75_s27, %s536_s14 }
  0x4e   :  { %p367_p7 = scmp.ne.s32.totalorder %s75_s27, %s366_s6  ;;  %p372_p9 = scmp.lt.s32.totalorder %s562_s5, %s366_s6 }
  0x50   :  { %p373_p10 = por %p372_p9, %p371_p8 }
  0x52   :  { %p374_p11 = pnand %p373_p10, %p367_p7 }
  0x54   :  { %377 = shalt.err (!%p374_p11)  }
  0x55   :  { %77 = dma.hbm_to_vmem [thread:$0]  %s64_s25, 16, %s75_s27, [#allocation3 + $0x3] }
  0x56   :  { %s511_s0 = smov [#allocation2 + $0x4]   ;;  %s258_s8 = sld [smem:[#allocation5 + $0x5]] }
  0x57   :  { %s91_s7 = sshll.u32 %s511_s0, 4  ;;  %s512_s9 = smov [#allocation2 + $0x5]   ;;  %s92_s7 = int_to_ptr.vmem [resolvable:$true] %s91_s7 }
  0x58   :  { %s108_s10 = sshll.u32 %s512_s9, 4  ;;  %s605_s11 = sld [smem:[#allocation5 + $0x6]]  ;;  %s607_s10 = int_to_ptr.vmem [resolvable:$true] %s108_s10 }
  0x59   :  { %s257_s12 = sshll.u32 %s256_s28, 4 }
  0x5a   :  { %s81_s16 = scalar_lea.hbm %s660_s1, %s257_s12 }
  0x5b   :  { %s378_s18 = scalar_lea.hbm %s81_s16, 16  ;;  %p381_p13 = scmp.lt.s32.totalorder %s81_s16, %s660_s1 }
  0x5c   :  { %p379_p12 = scmp.ne.s32.totalorder %s81_s16, %s378_s18  ;;  %p382_p0 = scmp.lt.s32.totalorder %s553_s29, %s378_s18 }
  0x5e   :  { %p383_p1 = por %p382_p0, %p381_p13 }
  0x60   :  { %p384_p2 = pnand %p383_p1, %p379_p12 }
  0x62   :  { %387 = shalt.err (!%p384_p2)  }
  0x63   :  { %s388_s22 = scalar_lea.vmem %s92_s7, 16  ;;  %p393_p4 = scmp.lt.s32.totalorder %s92_s7, %s536_s14 }
  0x64   :  { %p389_p3 = scmp.ne.s32.totalorder %s92_s7, %s388_s22  ;;  %p394_p5 = scmp.lt.s32.totalorder %s562_s5, %s388_s22 }
  0x66   :  { %p395_p6 = por %p394_p5, %p393_p4 }
  0x68   :  { %p396_p7 = pnand %p395_p6, %p389_p3 }
  0x6a   :  { %399 = shalt.err (!%p396_p7)  }
  0x6b   :  { %94 = dma.hbm_to_vmem [thread:$0]  %s81_s16, 16, %s92_s7, [#allocation3 + $0x4] }
  0x6c   :  { %s259_s23 = sshll.u32 %s258_s8, 4  ;;  %s513_s17 = smov [#allocation2 + $0x6]  }
  0x6d   :  { %s125_s20 = sshll.u32 %s513_s17, 4  ;;  %s98_s26 = scalar_lea.hbm %s660_s1, %s259_s23  ;;  %s621_s20 = int_to_ptr.vmem [resolvable:$true] %s125_s20 }
  0x6e   :  { %s400_s27 = scalar_lea.hbm %s98_s26, 16  ;;  %p403_p9 = scmp.lt.s32.totalorder %s98_s26, %s660_s1 }
  0x6f   :  { %p401_p8 = scmp.ne.s32.totalorder %s98_s26, %s400_s27  ;;  %p404_p10 = scmp.lt.s32.totalorder %s553_s29, %s400_s27 }
  0x71   :  { %p405_p11 = por %p404_p10, %p403_p9 }
  0x73   :  { %p406_p12 = pnand %p405_p11, %p401_p8 }
  0x75   :  { %409 = shalt.err (!%p406_p12)  }
  0x76   :  { %s410_s3 = scalar_lea.vmem %s607_s10, 16  ;;  %p415_p0 = scmp.lt.s32.totalorder %s607_s10, %s536_s14 }
  0x77   :  { %p411_p13 = scmp.ne.s32.totalorder %s607_s10, %s410_s3  ;;  %p416_p1 = scmp.lt.s32.totalorder %s562_s5, %s410_s3 }
  0x79   :  { %p417_p2 = por %p416_p1, %p415_p0 }
  0x7b   :  { %p418_p3 = pnand %p417_p2, %p411_p13 }
  0x7d   :  { %421 = shalt.err (!%p418_p3)  }
  0x7e   :  { %111 = dma.hbm_to_vmem [thread:$0]  %s98_s26, 16, %s607_s10, [#allocation3 + $0x5] }
  0x7f   :  { %s261_s4 = sshll.u32 %s605_s11, 4  ;;  %s262_s6 = sld [smem:[#allocation5 + $0x7]] }
  0x80   :  { %s115_s8 = scalar_lea.hbm %s660_s1, %s261_s4 }
  0x81   :  { %s422_s9 = scalar_lea.hbm %s115_s8, 16  ;;  %p425_p5 = scmp.lt.s32.totalorder %s115_s8, %s660_s1 }
  0x82   :  { %p423_p4 = scmp.ne.s32.totalorder %s115_s8, %s422_s9  ;;  %p426_p6 = scmp.lt.s32.totalorder %s553_s29, %s422_s9 }
  0x84   :  { %p427_p7 = por %p426_p6, %p425_p5 }
  0x86   :  { %p428_p8 = pnand %p427_p7, %p423_p4 }
  0x88   :  { %431 = shalt.err (!%p428_p8)  }
  0x89   :  { %s432_s10 = scalar_lea.vmem %s621_s20, 16  ;;  %p437_p10 = scmp.lt.s32.totalorder %s621_s20, %s536_s14 }
  0x8a   :  { %p433_p9 = scmp.ne.s32.totalorder %s621_s20, %s432_s10  ;;  %p438_p11 = scmp.lt.s32.totalorder %s562_s5, %s432_s10 }
  0x8c   :  { %p439_p12 = por %p438_p11, %p437_p10 }
  0x8e   :  { %p440_p13 = pnand %p439_p12, %p433_p9 }
  0x90   :  { %443 = shalt.err (!%p440_p13)  }
  0x91   :  { %128 = dma.hbm_to_vmem [thread:$0]  %s115_s8, 16, %s621_s20, [#allocation3 + $0x6] }
  0x92   :  { %s514_s11 = smov [#allocation2 + $0x7]   ;;  %s263_s16 = sshll.u32 %s262_s6, 4 }
  0x93   :  { %s142_s15 = sshll.u32 %s514_s11, 4  ;;  %s132_s21 = scalar_lea.hbm %s660_s1, %s263_s16  ;;  %s143_s15 = int_to_ptr.vmem [resolvable:$true] %s142_s15 }
  0x94   :  { %s444_s22 = scalar_lea.hbm %s132_s21, 16  ;;  %p447_p1 = scmp.lt.s32.totalorder %s132_s21, %s660_s1 }
  0x95   :  { %p445_p0 = scmp.ne.s32.totalorder %s132_s21, %s444_s22  ;;  %p448_p2 = scmp.lt.s32.totalorder %s553_s29, %s444_s22 }
  0x97   :  { %p449_p3 = por %p448_p2, %p447_p1 }
  0x99   :  { %p450_p4 = pnand %p449_p3, %p445_p0 }
  0x9b   :  { %453 = shalt.err (!%p450_p4)  }
  0x9c   :  { %s454_s24 = scalar_lea.vmem %s143_s15, 16  ;;  %p459_p6 = scmp.lt.s32.totalorder %s143_s15, %s536_s14 }
  0x9d   :  { %p455_p5 = scmp.ne.s32.totalorder %s143_s15, %s454_s24  ;;  %p460_p7 = scmp.lt.s32.totalorder %s562_s5, %s454_s24 }
  0x9f   :  { %p461_p8 = por %p460_p7, %p459_p6 }
  0xa1   :  { %p462_p9 = pnand %p461_p8, %p455_p5 }
  0xa3   :  { %465 = shalt.err (!%p462_p9)  }
  0xa4   :  { %145 = dma.hbm_to_vmem [thread:$0]  %s132_s21, 16, %s143_s15, [#allocation3 + $0x7] }
  0xa5   :  { %488 = dma.done.wait [#allocation3], 16 }
  0xa6   :  { %489 = vsyncadd [#allocation3], 4294967280 }
  0xa7   :  { %490 = dma.done.wait [#allocation3 + $0x1], 16 }
  0xa8   :  { %491 = vsyncadd [#allocation3 + $0x1], 4294967280 }
  0xa9   :  { %492 = dma.done.wait [#allocation3 + $0x2], 16 }
  0xaa   :  { %493 = vsyncadd [#allocation3 + $0x2], 4294967280 }
  0xab   :  { %494 = dma.done.wait [#allocation3 + $0x3], 16 }
  0xac   :  { %495 = vsyncadd [#allocation3 + $0x3], 4294967280 }
  0xad   :  { %496 = dma.done.wait [#allocation3 + $0x4], 16 }
  0xae   :  { %497 = vsyncadd [#allocation3 + $0x4], 4294967280 }
  0xaf   :  { %498 = dma.done.wait [#allocation3 + $0x5], 16 }
  0xb0   :  { %499 = vsyncadd [#allocation3 + $0x5], 4294967280 }
  0xb1   :  { %500 = dma.done.wait [#allocation3 + $0x6], 16 }
  0xb2   :  { %501 = vsyncadd [#allocation3 + $0x6], 4294967280 }
  0xb3   :  { %502 = dma.done.wait [#allocation3 + $0x7], 16 }
  0xb4   :  { %503 = vsyncadd [#allocation3 + $0x7], 4294967280  ;;  %s515_s1 = smov [#allocation6]   ;;  %v162_v0 = vld [vmem:[#allocation2] sm:$0xff] }
  0xb5   :  { %s170_s14 = sshll.u32 %s515_s1, 4  ;;  %163 = vst [vmem:[#allocation6] sm:$0xff] %v162_v0  ;;  %s171_s14 = int_to_ptr.vmem [resolvable:$true] %s170_s14 }
  0xb6   :  { %s466_s29 = scalar_lea.vmem %s171_s14, 128  ;;  %p471_p11 = scmp.lt.s32.totalorder %s171_s14, %s171_s14 }
  0xb7   :  { %p467_p10 = scmp.ne.s32.totalorder %s171_s14, %s466_s29  ;;  %p472_p12 = scmp.lt.s32.totalorder %s466_s29, %s466_s29 }
  0xb9   :  { %p473_p13 = por %p472_p12, %p471_p11 }
  0xbb   :  { %p474_p0 = pnand %p473_p13, %p467_p10 }
  0xbd   :  { %477 = shalt.err (!%p474_p0)
}
  0xbe   :  { %173 = dma.vmem_to_hbm [thread:$0]  %s171_s14, 128, %s661_s2, [#allocation7]  }
  0xbf   :  { %504 = dma.done.wait [#allocation7], 128  }
  0xc0   :  { %505 = vsyncadd [#allocation7], 4294967168 }
  0xc1   :  { %177 = vsyncpa [#allocation7], 1 }
  0xc2   :  { %178 = vsyncmov [#allocation3] }
  0xc5   :  { %s179_s25 = vpop.sfrf %178 }
  0xc6   :  { %p264_p1 = scmp.ne.s32.totalorder %s179_s25, 0 }
  0xc8   :  { %183 = shalt.err (%p264_p1)  }
  0xc9   :  { %185 = vsyncmov [#allocation3 + $0x1] }
  0xcc   :  { %s186_s26 = vpop.sfrf %185 }
  0xcd   :  { %p265_p2 = scmp.ne.s32.totalorder %s186_s26, 0 }
  0xcf   :  { %190 = shalt.err (%p265_p2)  }
  0xd0   :  { %192 = vsyncmov [#allocation3 + $0x2] }
  0xd3   :  { %s193_s27 = vpop.sfrf %192 }
  0xd4   :  { %p266_p3 = scmp.ne.s32.totalorder %s193_s27, 0 }
  0xd6   :  { %197 = shalt.err (%p266_p3)  }
  0xd7   :  { %199 = vsyncmov [#allocation3 + $0x3] }
  0xda   :  { %s200_s28 = vpop.sfrf %199 }
  0xdb   :  { %p267_p4 = scmp.ne.s32.totalorder %s200_s28, 0 }
  0xdd   :  { %204 = shalt.err (%p267_p4)  }
  0xde   :  { %206 = vsyncmov [#allocation3 + $0x4] }
  0xe1   :  { %s207_s2 = vpop.sfrf %206 }
  0xe2   :  { %p268_p5 = scmp.ne.s32.totalorder %s207_s2, 0 }
  0xe4   :  { %211 = shalt.err (%p268_p5)  }
  0xe5   :  { %213 = vsyncmov [#allocation3 + $0x5] }
  0xe8   :  { %s214_s30 = vpop.sfrf %213 }
  0xe9   :  { %p269_p6 = scmp.ne.s32.totalorder %s214_s30, 0 }
  0xeb   :  { %218 = shalt.err (%p269_p6)  }
  0xec   :  { %220 = vsyncmov [#allocation3 + $0x6] }
  0xef   :  { %s221_s3 = vpop.sfrf %220 }
  0xf0   :  { %p270_p7 = scmp.ne.s32.totalorder %s221_s3, 0 }
  0xf2   :  { %225 = shalt.err (%p270_p7)  }
  0xf3   :  { %227 = vsyncmov [#allocation3 + $0x7] }
  0xf6   :  { %s228_s4 = vpop.sfrf %227 }
  0xf7   :  { %p271_p8 = scmp.ne.s32.totalorder %s228_s4, 0 }
  0xf9   :  { %232 = shalt.err (%p271_p8)  }

</bundles_post_ra>
